<compile_context>
chip_gen: v7x
topology: tpu7x:2x2x1
jax: 0.10.0
libtpu: 0.0.40
codegen_flags: <defaults>
</compile_context>

<pallas_src>
import jax
import jax.numpy as jnp
from jax.experimental import pallas as pl
from jax.experimental.pallas import tpu as pltpu


def _identity_kernel(x_ref, o_ref):
    # Pure pass-through: load the current tile and store it unchanged.
    o_ref[...] = x_ref[...]


_SUBLANE = {1: 32, 2: 16, 4: 8, 8: 8}  # sublane packing multiple by dtype itemsize


def _pick_layout(total, itemsize):
    """Choose (rows, cols, row_tile) for a lane-dense 2D copy of `total` elems."""
    sub = _SUBLANE.get(itemsize, 8)

    # Lane-dense columns: largest multiple of 128 dividing `total` that still
    # leaves at least one full sublane group of rows.
    cols = None
    for k in (4096, 2048, 1024, 512, 256, 128):
        if total % k == 0 and (total // k) >= sub:
            cols = k
            break
    if cols is None:
        for k in (4096, 2048, 1024, 512, 256, 128):
            if total % k == 0:  # `total` is pre-padded to a multiple of 128
                cols = k
                break
    rows = total // cols

    # ~4 MiB blocks: per-step overhead (~0.35 us) is amortized, and the
    # double-buffered in+out tiles (4 buffers) stay well under every
    # generation's scoped-VMEM default.
    target_bytes = 4 * 1024 * 1024
    tr = max(sub, (target_bytes // (cols * itemsize)) // sub * sub)
    # Keep >= 2 grid steps when there are enough rows so the "parallel" axis
    # can be split across v7x's 2 TensorCores.
    if tr >= rows and rows > sub:
        tr = max(sub, ((rows + 1) // 2) // sub * sub)
    tr = min(tr, rows)
    if rows < sub:
        tr = rows  # full-extent block is always a legal block shape
    return rows, cols, tr


def identity_embedding_forward(x, d=None, **_):
    """Pallas implementation of IdentityEmbedding.forward(x, **_) -> x."""
    orig_shape = x.shape
    dtype = x.dtype
    total = x.size

    if total == 0:
        return x  # nothing to copy; identity is exact

    itemsize = jnp.dtype(dtype).itemsize

    # Flatten to a lane-dense slab; pad the tail only if total % 128 != 0.
    flat = x.reshape(-1)
    pad = (-total) % 128
    if pad:
        flat = jnp.pad(flat, (0, pad))

    rows, cols, tr = _pick_layout(total + pad, itemsize)
    x2 = flat.reshape(rows, cols)

    out2 = pl.pallas_call(
        _identity_kernel,
        out_shape=jax.ShapeDtypeStruct((rows, cols), dtype),
        grid_spec=pltpu.PrefetchScalarGridSpec(
            num_scalar_prefetch=0,
            grid=(pl.cdiv(rows, tr),),
            in_specs=[pl.BlockSpec((tr, cols), lambda i: (i, 0))],
            out_specs=pl.BlockSpec((tr, cols), lambda i: (i, 0)),
        ),
        compiler_params=pltpu.CompilerParams(
            dimension_semantics=("parallel",),
        ),
        # Output aliases the input slab: no separate output allocation, and a
        # zero-copy identity whenever the input buffer is donatable.
        input_output_aliases={0: 0},
        # Pure DMA-bound custom call: tell XLA's scheduler what it costs.
        cost_estimate=pl.CostEstimate(
            flops=0,
            transcendentals=0,
            bytes_accessed=2 * rows * cols * itemsize,
        ),
    )(x2)

    out_flat = out2.reshape(-1)
    if pad:
        out_flat = out_flat[:total]
    return out_flat.reshape(orig_shape)


if __name__ == "__main__":
    key = jax.random.PRNGKey(0)
    # Small NCHW input consistent with a conv-style embedding.
    x = jax.random.normal(key, (2, 4, 16, 16), dtype=jnp.float32)

    fwd = jax.jit(identity_embedding_forward)
    y = fwd(x, d=3)
    y = jax.block_until_ready(y)

    assert y.shape == x.shape, (y.shape, x.shape)
    assert y.dtype == x.dtype, (y.dtype, x.dtype)
    assert bool(jnp.all(y == x)), "identity kernel output mismatch"

    print("KERNEL_OK")
</pallas_src>

<mosaic_0001>
module attributes {stable_mosaic.version = 11 : i64} {
  func.func @_identity_kernel(%arg0: i32, %arg1: memref<8x256xf32, #tpu.memory_space<vmem>>, %arg2: memref<8x256xf32, #tpu.memory_space<vmem>>) attributes {dimension_semantics = [#tpu.dimension_semantics<parallel>], iteration_bounds = array<i64: 1>, scalar_prefetch = 0 : i64, scratch_operands = 0 : i64, tpu.core_type = #tpu.core_type<tc>, window_params = [{transform_indices = @transform_0, window_bounds = array<i64: 8, 256>}, {transform_indices = @transform_1, window_bounds = array<i64: 8, 256>}]} {
    %c0 = arith.constant 0 : index
    %c0_0 = arith.constant 0 : index
    %0 = vector.load %arg1[%c0, %c0_0] : memref<8x256xf32, #tpu.memory_space<vmem>>, vector<8x256xf32>
    %c0_1 = arith.constant 0 : index
    %c0_2 = arith.constant 0 : index
    %1 = vector.load %arg2[%c0_1, %c0_2] : memref<8x256xf32, #tpu.memory_space<vmem>>, vector<8x256xf32>
    tpu.vector_store %arg2[%c0_1, %c0_2], %0 {strides = array<i32>} : memref<8x256xf32, #tpu.memory_space<vmem>>, vector<8x256xf32>,
    return
  }
  func.func @transform_0(%arg0: i32) -> (i32, i32) {
    %c0_i32 = arith.constant 0 : i32
    %c0_i32_0 = arith.constant 0 : i32
    return %arg0, %c0_i32 : i32, i32
  }
  func.func @transform_1(%arg0: i32) -> (i32, i32) {
    %c0_i32 = arith.constant 0 : i32
    %c0_i32_0 = arith.constant 0 : i32
    return %arg0, %c0_i32 : i32, i32
  }
}

</mosaic_0001>

<bundles_post_ra>
// kernel: identity_embedding_forward.1
= control target key start
LH: loop header
LB: loop body
LE: loop exit
PB: predicated region body
PF: predicated region fallthrough
CT: control target
= control target key end

     0   :  { %s38_s0 = inlined_call_operand.vmem [shape: f32[8,256], index: 0, kind: input, shape index: {}, may-alias: {0,1}]   ;;  %s39_s1 = inlined_call_operand.vmem [shape: f32[8,256], index: 1, kind: output, shape index: {}, may-alias: {0,1}]  }
   0x1   :  { %v8_v0 = vld [vmem:[%s38_s0] sm:$0xff]  ;;  %v9_v1 = vld [vmem:[%s38_s0 + $0x8] sm:$0xff] }
   0x2   :  { %10 = vst [vmem:[%s39_s1] sm:$0xff] %v8_v0  ;;  %11 = vst [vmem:[%s39_s1 + $0x8] sm:$0xff] %v9_v1 }

</bundles_post_ra>
